<compile_context>
chip_gen: v7x
topology: tpu7x:2x2x1
jax: 0.10.0
libtpu: 0.0.40
codegen_flags: <defaults>
</compile_context>

<pallas_src>
import math

import jax
import jax.numpy as jnp
from jax.experimental import pallas as pl
from jax.experimental.pallas import tpu as pltpu


def _transpose_tile_kernel(x_ref, o_ref):
    # x_ref: (TS, TH) VMEM tile, o_ref: (TH, TS) VMEM tile — pure XLU transpose.
    o_ref[...] = x_ref[...].T


def _round_up(x, m):
    return ((x + m - 1) // m) * m


def _transpose_last2_pallas(x, *, max_tile=512):
    """(..., S, H) -> (..., H, S) via a tiled Pallas transpose kernel."""
    lead = x.shape[:-2]
    S, H = x.shape[-2], x.shape[-1]
    B = math.prod(lead) if lead else 1
    x3 = x.reshape(B, S, H)

    # Both TS and TH show up as the lane (last) dim of one of the blocks
    # (TH on the input tile, TS on the output tile), so keep both multiples of
    # 128; 128 also covers the sublane packing of f32/bf16/int8 (8/16/32).
    LANE = 128
    TS = min(max_tile, _round_up(S, LANE))
    TH = min(max_tile, _round_up(H, LANE))

    # Pad S/H up to tile multiples so every tile is full and unmasked.
    Sp = _round_up(S, TS)
    Hp = _round_up(H, TH)
    if (Sp, Hp) != (S, H):
        x3 = jnp.pad(x3, ((0, 0), (0, Sp - S), (0, Hp - H)))

    nS = Sp // TS
    nH = Hp // TH

    out = pl.pallas_call(
        _transpose_tile_kernel,
        out_shape=jax.ShapeDtypeStruct((B, Hp, Sp), x.dtype),
        grid_spec=pltpu.PrefetchScalarGridSpec(
            num_scalar_prefetch=0,
            # batch outer, H-tile middle, S-tile inner -> row-major output order.
            grid=(B, nH, nS),
            in_specs=[
                pl.BlockSpec((pl.Squeezed(), TS, TH),
                             lambda b, h, s: (b, s, h)),
            ],
            out_specs=pl.BlockSpec((pl.Squeezed(), TH, TS),
                                   lambda b, h, s: (b, h, s)),
        ),
        compiler_params=pltpu.CompilerParams(
            dimension_semantics=("parallel", "parallel", "parallel")),
    )(x3)

    if (Sp, Hp) != (S, H):
        out = out[:, :H, :S]
    return out.reshape(lead + (H, S))


def transpose_pallas(x, dims):
    """Pallas equivalent of torch.Tensor.transpose(*dims)."""
    assert len(dims) == 2, "dims must be a tuple of two dimensions"
    d0, d1 = sorted(d % x.ndim for d in dims)
    if d0 == d1:
        return x
    if (d0, d1) == (x.ndim - 2, x.ndim - 1):
        return _transpose_last2_pallas(x)
    # TODO(synk): swaps not involving the last two axes are pure DMA
    # re-addressing (index_map permutation, no XLU work); not needed for the
    # pipeline.py usage (Transpose((1, 2)) on (B, S, H)).
    raise NotImplementedError(
        f"transpose_pallas only implements swapping the last two axes; got dims={dims}")


class TransposePallas:
    """Mirror of the PyTorch Transpose module (no parameters)."""

    def __init__(self, dims):
        assert len(dims) == 2, "dims must be a tuple of two dimensions"
        self.dims = dims

    def __call__(self, x):
        return transpose_pallas(x, self.dims)


if __name__ == "__main__":
    key = jax.random.PRNGKey(0)
    B, S, H = 2, 8, 32                    # small shapes consistent with module usage
    x = jax.random.normal(key, (B, S, H), dtype=jnp.float32)

    mod = TransposePallas(dims=(1, 2))
    y = mod(x)
    jax.block_until_ready(y)

    # Correctness check against plain JAX (== torch .transpose(1, 2) semantics)
    y_ref = jnp.swapaxes(x, 1, 2)
    assert y.shape == (B, H, S)
    assert y.dtype == x.dtype
    assert jnp.array_equal(y, y_ref)

    print("KERNEL_OK")
</pallas_src>

<mosaic_0001>
module attributes {stable_mosaic.version = 11 : i64} {
  func.func @_transpose_tile_kernel(%arg0: i32, %arg1: i32, %arg2: i32, %arg3: memref<1x128x128xf32, #tpu.memory_space<vmem>>, %arg4: memref<1x128x128xf32, #tpu.memory_space<vmem>>) attributes {dimension_semantics = [#tpu.dimension_semantics<parallel>, #tpu.dimension_semantics<parallel>, #tpu.dimension_semantics<parallel>], iteration_bounds = array<i64: 2, 1, 1>, scalar_prefetch = 0 : i64, scratch_operands = 0 : i64, tpu.core_type = #tpu.core_type<tc>, window_params = [{transform_indices = @transform_0, window_bounds = array<i64: 1, 128, 128>}, {transform_indices = @transform_1, window_bounds = array<i64: 1, 128, 128>}]} {
    %c0 = arith.constant 0 : index
    %c0_0 = arith.constant 0 : index
    %c0_1 = arith.constant 0 : index
    %0 = vector.load %arg3[%c0, %c0_0, %c0_1] : memref<1x128x128xf32, #tpu.memory_space<vmem>>, vector<1x128x128xf32>
    %1 = vector.shape_cast %0 : vector<1x128x128xf32> to vector<128x128xf32>
    %2 = tpu.transpose %1, [1, 0] : vector<128x128xf32> -> vector<128x128xf32>
    %c0_2 = arith.constant 0 : index
    %c0_3 = arith.constant 0 : index
    %c0_4 = arith.constant 0 : index
    %3 = vector.load %arg4[%c0_2, %c0_3, %c0_4] : memref<1x128x128xf32, #tpu.memory_space<vmem>>, vector<1x128x128xf32>
    %4 = vector.shape_cast %3 : vector<1x128x128xf32> to vector<128x128xf32>
    %5 = vector.shape_cast %2 : vector<128x128xf32> to vector<1x128x128xf32>
    tpu.vector_store %arg4[%c0_2, %c0_3, %c0_4], %5 {strides = array<i32>} : memref<1x128x128xf32, #tpu.memory_space<vmem>>, vector<1x128x128xf32>,
    return
  }
  func.func @transform_0(%arg0: i32, %arg1: i32, %arg2: i32) -> (i32, i32, i32) {
    %c0_i32 = arith.constant 0 : i32
    return %arg0, %arg2, %arg1 : i32, i32, i32
  }
  func.func @transform_1(%arg0: i32, %arg1: i32, %arg2: i32) -> (i32, i32, i32) {
    %c0_i32 = arith.constant 0 : i32
    return %arg0, %arg1, %arg2 : i32, i32, i32
  }
}

</mosaic_0001>

<bundles_post_ra>
// kernel: tpu_custom_call.1
= control target key start
LH: loop header
LB: loop body
LE: loop exit
PB: predicated region body
PF: predicated region fallthrough
CT: control target
= control target key end

     0   :  { %6 = vsyncpa [#allocation3], 0  ;;  %s769_s0 = inlined_call_operand.hbm [shape: f32[2,128,128], index: 0, kind: input, shape index: {}]   ;;  %s770_s1 = inlined_call_operand.hbm [shape: f32[2,128,128], index: 1, kind: output, shape index: {}]  }
   0x1   :  { %8 = vsyncpa [#allocation3 + $0x1], 0 }
   0x2   :  { %9 = vsyncpa [#allocation4], 0 }
   0x3   :  { %11 = vsyncpa [#allocation4 + $0x1], 0  ;;  %s553_s6 = smov 0   ;;  %s555_s7 = smov 0  }
   0x4   :  { %s557_s8 = smov 0   ;;  %s559_s9 = smov 0  }
   0x5   :  { %s561_s10 = smov 0   ;;  %s563_s11 = smov 0  }
   0x6 LB: > { %s340_s12 = sadd.s32 4294967295, %s535_s11   ;;  %s341_s13 = sadd.s32 4294967294, %s535_s11   ;;  %s535_s11 = sphi %s563_s11, %s17_s11   ;;  %s531_s10 = sphi %s561_s10, %s785_s10   ;;  %s527_s9 = sphi %s559_s9, %s784_s9   ;;  %s523_s8 = sphi %s557_s8, %s783_s8   ;;  %s519_s7 = sphi %s555_s7, %s782_s7   ;;  %s515_s6 = sphi %s553_s6, %s781_s6  }
   0x7   : > { %s36_s14 = sadd.s32 1, %s531_s10  ;;  %s47_s15 = sadd.s32 1, %s523_s8 }
   0x8   : > { %p38_p0 = scmp.ge.s32.totalorder %s36_s14, 2  ;;  %p54_p1 = scmp.ne.s32.totalorder %s523_s8, %s519_s7 }
   0x9   : > { %p55_p2 = scmp.eq.s32.totalorder %s535_s11, 0  ;;  %p60_p3 = scmp.ne.s32.totalorder %s519_s7, %s515_s6 }
   0xa   : > { %s787_s14 = smov (%p38_p0, %s36_s14), 0  ;;  %p61_p5 = scmp.eq.s32.totalorder %s340_s12, 0 }
   0xb   : > { %p594_p4 = por %p55_p2, %p54_p1  ;;  %s40_s17 = ssub.s32 %s531_s10, %s787_s14 }
   0xc   : > { %p88_p6 = scmp.eq.s32.totalorder %s340_s12, 1  ;;  %p45_p7 = scmp.eq.s32.totalorder %s40_s17, 0 }
   0xd   : > { %p600_p8 = por %p61_p5, %p60_p3  ;;  %p94_p10 = scmp.eq.s32.totalorder %s341_s13, 1 }
   0xe   : > { %p604_p9 = por %p88_p6, %p54_p1  ;;  %p369_p13 = scmp.lt.s32.totalorder %s535_s11, 2 }
   0xf   : > { %s609_s20 = scalar_select %p45_p7, %s523_s8, %s47_s15  }
  0x10   : > { %s774_s19 = scalar_select %p604_p9, 1, 0 }
  0x11   : > { %p611_p11 = por %p94_p10, %p60_p3  ;;  %s114_s22 = sand.u32 1, %s523_s8  }
  0x12   : > { %s344_s23 = sshll.u32 %s114_s22, 7  ;;  %s355_s24 = sshll.u32 %s531_s10, 11 }
  0x13   : > { %s775_s21 = scalar_select %p611_p11, 1, 0 }
  0x14   : > { %s622_s27 = scalar_lea.hbm %s769_s0, %s355_s24  ;;  %s118_s28 = scalar_lea.vmem [#allocation2], %s344_s23 }
  0x15   : > { %s128_s29 = sshll.u32 %s118_s28, 4  ;;  %p628_p0 = pnand %p369_p13, %p594_p4  ;;  %s624_s29 = int_to_ptr.vmem [resolvable:$true] %s128_s29 }
  0x16   : > { %s633_s2 = scalar_lea.sflag [#allocation3], %s114_s22  ;;  %s423_s3 = scalar_lea.hbm %s622_s27, 2048 }
  0x17   : > { %p424_p2 = scmp.ne.s32.totalorder %s622_s27, %s423_s3  ;;  %p425_p3 = pneg %p628_p0 }
  0x18   : > { %s428_s12 = scalar_lea.hbm %s769_s0, 4096  ;;  %p429_p4 = scmp.lt.u32.totalorder %s622_s27, %s769_s0 }
  0x19   : > { %p426_p5 = pnand %p425_p3, %p424_p2  ;;  %p430_p7 = scmp.lt.u32.totalorder %s428_s12, %s423_s3 }
  0x1a   : > { %p432_p13 = scmp.lt.u32.totalorder %s423_s3, %s622_s27 }
  0x1b   : > { %p427_p6 = pneg %p426_p5  ;;  %p431_p10 = por %p430_p7, %p429_p4 }
  0x1d   : > { %p433_p12 = por %p432_p13, %p431_p10 }
  0x1f   : > { %p434_p1 = pnand %p433_p12, %p427_p6 }
  0x21   : > { %437 = shalt.err (!%p434_p1)
}
  0x22   : > { %s438_s16 = scalar_lea.vmem %s624_s29, 2048  ;;  %s537_s17 = smov [#allocation2]  }
  0x23   : > { %p439_p2 = scmp.ne.s32.totalorder %s624_s29, %s438_s16  ;;  %s443_s22 = sshll.u32 %s537_s17, 4  ;;  %s444_s22 = int_to_ptr.vmem [resolvable:$false] %s443_s22 }
  0x24   : > { %s445_s23 = scalar_lea.vmem %s444_s22, 4096  ;;  %p446_p9 = scmp.lt.s32.totalorder %s624_s29, %s444_s22 }
  0x25   : > { %p441_p5 = pnand %p439_p2, %p425_p3  ;;  %p447_p4 = scmp.lt.s32.totalorder %s445_s23, %s438_s16 }
  0x27   : > { %p442_p11 = pneg %p441_p5  ;;  %p448_p7 = por %p447_p4, %p446_p9 }
  0x29   : > { %p449_p10 = pnand %p448_p7, %p442_p11 }
  0x2b   : > { %452 = shalt.err (!%p449_p10)
}
  0x2c   : > { %s538_s24 = smov 128   ;;  %s539_s25 = smov 8  }
  0x2d   : > { %364 = dma.hbm_to_vmem [thread:$0]  (!%p628_p0), %s622_s27, 2048, %s624_s29, %s633_s2, %s538_s24, %s538_s24, %s539_s25  }
  0x2e   : > { %p136_p12 = scmp.lt.s32.totalorder %s535_s11, 3  ;;  %p777_p1 = scmp.ge.s32.totalorder %s535_s11, 1 }
  0x30   : > { %p137_p3 = pnand %p777_p1, %p136_p12 }
  0x31   : > { %s665_s26 = sand.u32 (!%p137_p3), 1, %s519_s7  }
  0x32   : > { %140 = sbr.rel (%p137_p3) target bundleno = 263 (0x107), region = 24  ;;  %s348_s28 = sshll.u32 (!%p137_p3), %s665_s26, 7 }
  0x33   : > { %s143_s3 = scalar_lea.sflag (!%p137_p3), [#allocation3], %s665_s26  ;;  %s671_s4 = scalar_lea.vmem (!%p137_p3), [#allocation2], %s348_s28 }
  0x39   : > { %506 = dma.done.wait (%p600_p8), %s143_s3, 2048  }
  0x3a   : > { %508 = vsyncadd (%p600_p8), %s143_s3, 4294965248  ;;  %v167_v0 = vld [vmem:[%s671_s4] sm:$0xff]  ;;  %v168_v1 = vld [vmem:[%s671_s4 + $0x8] sm:$0xff]  ;;  %s695_s18 = scalar_lea.vmem [#allocation5], %s348_s28  ;;  %s356_s27 = sshll.u32 %s527_s9, 11 }
  0x3b   : > { %183 = vxpose.xlu0.b32.start [1/16] %v167_v0, 128  ;;  %v169_v2 = vld [vmem:[%s671_s4 + $0x10] sm:$0xff]  ;;  %v170_v3 = vld [vmem:[%s671_s4 + $0x18] sm:$0xff]  ;;  %v171_v4 = vld [vmem:[%s671_s4 + $0x20] sm:$0xff]  ;;  %s248_s29 = sshll.u32 %s695_s18, 4  ;;  %s717_s5 = scalar_lea.hbm %s770_s1, %s356_s27  ;;  %s719_s29 = int_to_ptr.vmem [resolvable:$true] %s248_s29 }
  0x3c   : > { %v172_v5 = vld [vmem:[%s671_s4 + $0x28] sm:$0xff]  ;;  %v173_v6 = vld [vmem:[%s671_s4 + $0x30] sm:$0xff]  ;;  %v174_v7 = vld [vmem:[%s671_s4 + $0x38] sm:$0xff]  ;;  %s232_s12 = scalar_lea.sflag [#allocation4], %s665_s26  ;;  %s453_s13 = scalar_lea.vmem %s719_s29, 2048 }
  0x3d   : > { %v175_v8 = vld [vmem:[%s671_s4 + $0x40] sm:$0xff]  ;;  %v176_v9 = vld [vmem:[%s671_s4 + $0x48] sm:$0xff]  ;;  %v177_v10 = vld [vmem:[%s671_s4 + $0x50] sm:$0xff]  ;;  %p454_p8 = scmp.ne.s32.totalorder %s719_s29, %s453_s13  ;;  %p778_p9 = scmp.ne.s32.totalorder %s774_s19, 0 }
  0x3e   : > { %v178_v11 = vld [vmem:[%s671_s4 + $0x58] sm:$0xff]  ;;  %v179_v12 = vld [vmem:[%s671_s4 + $0x60] sm:$0xff]  ;;  %v180_v13 = vld [vmem:[%s671_s4 + $0x68] sm:$0xff]  ;;  %s540_s9 = smov [#allocation5]  }
  0x3f   : > { %184 = vxpose.xlu0.b32.cont [2/16] %v168_v1, 128  ;;  %v181_v14 = vld [vmem:[%s671_s4 + $0x70] sm:$0xff]  ;;  %v182_v15 = vld [vmem:[%s671_s4 + $0x78] sm:$0xff]  ;;  %p455_p11 = pnand %p454_p8, %p778_p9  ;;  %s457_s15 = sshll.u32 %s540_s9, 4  ;;  %s458_s15 = int_to_ptr.vmem [resolvable:$false] %s457_s15 }
  0x40   : > { %s459_s16 = scalar_lea.vmem %s458_s15, 4096  ;;  %p460_p6 = scmp.lt.s32.totalorder %s719_s29, %s458_s15 }
  0x41   : > { %p456_p0 = pneg %p455_p11  ;;  %p461_p13 = scmp.lt.s32.totalorder %s459_s16, %s453_s13 }
  0x43   : > { %185 = vxpose.xlu0.b32.cont [3/16] %v169_v2, 128  ;;  %p462_p2 = por %p461_p13, %p460_p6 }
  0x45   : > { %p463_p5 = pnand %p462_p2, %p456_p0 }
  0x47   : > { %186 = vxpose.xlu0.b32.cont [4/16] %v170_v3, 128 }
  0x4b   : > { %187 = vxpose.xlu0.b32.cont [5/16] %v171_v4, 128 }
  0x4f   : > { %188 = vxpose.xlu0.b32.cont [6/16] %v172_v5, 128 }
  0x53   : > { %189 = vxpose.xlu0.b32.cont [7/16] %v173_v6, 128 }
  0x57   : > { %190 = vxpose.xlu0.b32.cont [8/16] %v174_v7, 128 }
  0x5b   : > { %191 = vxpose.xlu0.b32.cont [9/16] %v175_v8, 128 }
  0x5f   : > { %192 = vxpose.xlu0.b32.cont [10/16] %v176_v9, 128 }
  0x63   : > { %193 = vxpose.xlu0.b32.cont [11/16] %v177_v10, 128 }
  0x67   : > { %194 = vxpose.xlu0.b32.cont [12/16] %v178_v11, 128 }
  0x6b   : > { %195 = vxpose.xlu0.b32.cont [13/16] %v179_v12, 128 }
  0x6f   : > { %196 = vxpose.xlu0.b32.cont [14/16] %v180_v13, 128 }
  0x73   : > { %197 = vxpose.xlu0.b32.cont [15/16] %v181_v14, 128 }
  0x77   : > { %198 = vxpose.xlu0.b32.end [16/16] %v182_v15, 128 }
  0xbb   : > { %v199_v16 = vpop.trf.xlu0 }
  0xbc   : > { %215 = vst [vmem:[%s695_s18] sm:$0xff] %v199_v16 }
  0xbf   : > { %v200_v17 = vpop.trf.xlu0 }
  0xc0   : > { %216 = vst [vmem:[%s695_s18 + $0x8] sm:$0xff] %v200_v17 }
  0xc3   : > { %v201_v18 = vpop.trf.xlu0 }
  0xc4   : > { %217 = vst [vmem:[%s695_s18 + $0x10] sm:$0xff] %v201_v18 }
  0xc7   : > { %v202_v19 = vpop.trf.xlu0 }
  0xc8   : > { %218 = vst [vmem:[%s695_s18 + $0x18] sm:$0xff] %v202_v19 }
  0xcb   : > { %v203_v20 = vpop.trf.xlu0 }
  0xcc   : > { %219 = vst [vmem:[%s695_s18 + $0x20] sm:$0xff] %v203_v20 }
  0xcf   : > { %v204_v21 = vpop.trf.xlu0 }
  0xd0   : > { %220 = vst [vmem:[%s695_s18 + $0x28] sm:$0xff] %v204_v21 }
  0xd3   : > { %v205_v22 = vpop.trf.xlu0 }
  0xd4   : > { %221 = vst [vmem:[%s695_s18 + $0x30] sm:$0xff] %v205_v22 }
  0xd7   : > { %v206_v23 = vpop.trf.xlu0 }
  0xd8   : > { %222 = vst [vmem:[%s695_s18 + $0x38] sm:$0xff] %v206_v23 }
  0xdb   : > { %v207_v24 = vpop.trf.xlu0 }
  0xdc   : > { %223 = vst [vmem:[%s695_s18 + $0x40] sm:$0xff] %v207_v24 }
  0xdf   : > { %v208_v25 = vpop.trf.xlu0 }
  0xe0   : > { %224 = vst [vmem:[%s695_s18 + $0x48] sm:$0xff] %v208_v25 }
  0xe3   : > { %v209_v26 = vpop.trf.xlu0 }
  0xe4   : > { %225 = vst [vmem:[%s695_s18 + $0x50] sm:$0xff] %v209_v26 }
  0xe7   : > { %v210_v27 = vpop.trf.xlu0 }
  0xe8   : > { %226 = vst [vmem:[%s695_s18 + $0x58] sm:$0xff] %v210_v27 }
  0xeb   : > { %v211_v28 = vpop.trf.xlu0 }
  0xec   : > { %227 = vst [vmem:[%s695_s18 + $0x60] sm:$0xff] %v211_v28 }
  0xef   : > { %v212_v29 = vpop.trf.xlu0 }
  0xf0   : > { %228 = vst [vmem:[%s695_s18 + $0x68] sm:$0xff] %v212_v29 }
  0xf3   : > { %v213_v30 = vpop.trf.xlu0 }
  0xf4   : > { %229 = vst [vmem:[%s695_s18 + $0x70] sm:$0xff] %v213_v30 }
  0xf7   : > { %v214_v31 = vpop.trf.xlu0 }
  0xf8   : > { %230 = vst [vmem:[%s695_s18 + $0x78] sm:$0xff] %v214_v31 }
  0xf9   : > { %466 = shalt.err (!%p463_p5)
}
  0xfa   : > { %s467_s17 = scalar_lea.hbm %s717_s5, 2048  ;;  %s471_s24 = scalar_lea.hbm %s770_s1, 4096 }
  0xfb   : > { %p468_p4 = scmp.ne.s32.totalorder %s717_s5, %s467_s17  ;;  %p472_p12 = scmp.lt.u32.totalorder %s717_s5, %s770_s1 }
  0xfc   : > { %p473_p1 = scmp.lt.u32.totalorder %s471_s24, %s467_s17  ;;  %p475_p8 = scmp.lt.u32.totalorder %s467_s17, %s717_s5 }
  0xfd   : > { %p469_p7 = pnand %p468_p4, %p778_p9 }
  0xfe   : > { %p474_p3 = por %p473_p1, %p472_p12 }
  0xff   : > { %p470_p10 = pneg %p469_p7 }
 0x100   : > { %p476_p11 = por %p475_p8, %p474_p3 }
 0x102   : > { %p477_p0 = pnand %p476_p11, %p470_p10 }
 0x104   : > { %480 = shalt.err (!%p477_p0)
}
 0x105   : > { %s541_s3 = smov 128   ;;  %s542_s4 = smov 8  }
 0x106   : > { %359 = dma.vmem_to_hbm [thread:$0]  (%p778_p9), %s719_s29, 2048, %s717_s5, %s232_s12, %s541_s3, %s541_s3, %s542_s4  }
 0x107 PF: > { %s263_s18 = sand.u32 1, %s515_s6   ;;  %p779_p6 = scmp.ne.s32.totalorder %s775_s21, 0 }
 0x108   : > { %p780_p13 = scmp.ge.s32.totalorder %s535_s11, 2  ;;  %s264_s27 = scalar_lea.sflag [#allocation4], %s263_s18 }
 0x10a   : > { %p366_p2 = pnand %p780_p13, %p779_p6 }
 0x10c   : > { %510 = dma.done.wait (!%p366_p2), %s264_s27, 2048  }
 0x10d   : > { %512 = vsyncadd (!%p366_p2), %s264_s27, 4294965248  ;;  %s17_s11 = sadd.s32 1, %s535_s11   ;;  %s781_s6 = smov %s519_s7 }
 0x10e   : > { %p14_p5 = scmp.ge.s32.totalorder %s17_s11, 4   ;;  %s782_s7 = smov %s523_s8 }
 0x10f   : > { %s783_s8 = smov %s609_s20  ;;  %s784_s9 = smov %s531_s10 }
 0x110   : > { %s785_s10 = smov %s787_s14  ;;  %16 = sbr.rel (!%p14_p5) target bundleno = 6 (0x6), region = 69 }
 0x117   :  { %269 = vsyncpa [#allocation3], 1 }
 0x118   :  { %271 = vsyncpa [#allocation3 + $0x1], 1 }
 0x119   :  { %272 = vsyncpa [#allocation4], 1 }
 0x11a   :  { %274 = vsyncpa [#allocation4 + $0x1], 1 }

</bundles_post_ra>
